<compile_context>
chip_gen: v5e
topology: v5e:2x2
jax: 0.10.0
libtpu: 0.0.40
codegen_flags: <defaults>
</compile_context>

<pallas_src>
import numpy as np
import jax
import jax.numpy as jnp
from jax.experimental import pallas as pl
from jax.experimental.pallas import tpu as pltpu


def init_weights_bias(size_in: int, size_out: int, image_shape):
    """Mirror of OcclusionThirdLayer.init_weights_bias (used for the reference check)."""
    weights = np.zeros((size_out, size_in), dtype=np.float32)
    block_size = image_shape[1]
    block_num = size_out // block_size
    for i in range(block_num):
        for j in range(block_size):
            weights[i * block_size + j, i * block_size * 2 + j] = -1.0
            weights[i * block_size + j, i * block_size * 2 + block_size + j] = -1.0
    bias = np.ones((size_out,), dtype=np.float32)
    return weights, bias


def _occlusion_third_kernel(xa_ref, xb_ref, o_ref):
    # xa_ref, xb_ref, o_ref: (1, TN) f32 tiles.
    # y = W @ x + bias  ==  -(x_first_half + x_second_half) + 1  (bias is all ones).
    o_ref[...] = 1.0 - (xa_ref[...] + xb_ref[...])


def _pick_tile(size_out: int, cap: int) -> int:
    """Largest multiple of 128 that divides size_out and is <= cap; else full extent."""
    best = None
    t = 128
    while t <= min(size_out, cap):
        if size_out % t == 0:
            best = t
        t += 128
    return best if best is not None else size_out


def occlusion_third_layer(x, size_out: int, image_shape, tile_cap: int = 2048):
    """x: (size_in,) -> (size_out,), identical to torch.matmul(W, x) + bias."""
    block_size = image_shape[1]
    block_num = size_out // block_size
    assert size_out == block_num * block_size, "size_out must be a multiple of image_shape[1]"
    size_in_used = 2 * size_out
    assert x.shape[0] >= size_in_used, "size_in must be at least 2 * size_out"

    x = x.astype(jnp.float32)
    # Deinterleave x into the two columns W touches per output row (layout plumbing).
    xp = x[:size_in_used].reshape(block_num, 2, block_size)
    xa = xp[:, 0, :].reshape(1, size_out)   # x[i*2B + j]
    xb = xp[:, 1, :].reshape(1, size_out)   # x[i*2B + B + j]

    tn = _pick_tile(size_out, tile_cap)
    grid = (size_out // tn,)

    out = pl.pallas_call(
        _occlusion_third_kernel,
        out_shape=jax.ShapeDtypeStruct((1, size_out), jnp.float32),
        grid=grid,
        in_specs=[
            pl.BlockSpec((1, tn), lambda i: (0, i)),
            pl.BlockSpec((1, tn), lambda i: (0, i)),
        ],
        out_specs=pl.BlockSpec((1, tn), lambda i: (0, i)),
        compiler_params=pltpu.CompilerParams(
            dimension_semantics=("parallel",),
        ),
    )(xa, xb)
    return out.reshape(size_out)


if __name__ == "__main__":
    # Small shapes consistent with the module (GTSRB-style 32x32 images):
    # block_size = image_shape[1] = 32, size_out a multiple of it, size_in = 2*size_out.
    image_shape = (3, 32, 32)
    size_out = 1024
    size_in = 2 * size_out  # 2048

    key = jax.random.PRNGKey(0)
    x = jax.random.normal(key, (size_in,), dtype=jnp.float32)

    # tile_cap=512 -> TN=512, grid=(2,): exercises the tiled, parallel grid path.
    y = occlusion_third_layer(x, size_out=size_out, image_shape=image_shape, tile_cap=512)
    y = jax.block_until_ready(y)

    # Reference check against the dense W @ x + bias with the exact PyTorch parameters.
    W, b = init_weights_bias(size_in, size_out, image_shape)
    y_ref = W @ np.asarray(x) + b
    np.testing.assert_allclose(np.asarray(y), y_ref, rtol=1e-6, atol=1e-6)

    print("KERNEL_OK")
</pallas_src>

<mosaic_0001>
module attributes {stable_mosaic.version = 11 : i64} {
  func.func @_occlusion_third_kernel(%arg0: i32, %arg1: memref<1x512xf32, #tpu.memory_space<vmem>>, %arg2: memref<1x512xf32, #tpu.memory_space<vmem>>, %arg3: memref<1x512xf32, #tpu.memory_space<vmem>>) attributes {dimension_semantics = [#tpu.dimension_semantics<parallel>], iteration_bounds = array<i64: 2>, scalar_prefetch = 0 : i64, scratch_operands = 0 : i64, tpu.core_type = #tpu.core_type<tc>, window_params = [{transform_indices = @transform_0, window_bounds = array<i64: 1, 512>}, {transform_indices = @transform_1, window_bounds = array<i64: 1, 512>}, {transform_indices = @transform_2, window_bounds = array<i64: 1, 512>}]} {
    %c0 = arith.constant 0 : index
    %c0_0 = arith.constant 0 : index
    %0 = vector.load %arg1[%c0, %c0_0] : memref<1x512xf32, #tpu.memory_space<vmem>>, vector<1x512xf32>
    %c0_1 = arith.constant 0 : index
    %c0_2 = arith.constant 0 : index
    %1 = vector.load %arg2[%c0_1, %c0_2] : memref<1x512xf32, #tpu.memory_space<vmem>>, vector<1x512xf32>
    %2 = arith.addf %0, %1 : vector<1x512xf32>
    %cst = arith.constant 1.000000e+00 : f32
    %3 = vector.broadcast %cst : f32 to vector<1x512xf32>
    %4 = arith.subf %3, %2 : vector<1x512xf32>
    %c0_3 = arith.constant 0 : index
    %c0_4 = arith.constant 0 : index
    %5 = vector.load %arg3[%c0_3, %c0_4] : memref<1x512xf32, #tpu.memory_space<vmem>>, vector<1x512xf32>
    tpu.vector_store %arg3[%c0_3, %c0_4], %4 {strides = array<i32>} : memref<1x512xf32, #tpu.memory_space<vmem>>, vector<1x512xf32>,
    return
  }
  func.func @transform_0(%arg0: i32) -> (i32, i32) {
    %c0_i32 = arith.constant 0 : i32
    %c0_i32_0 = arith.constant 0 : i32
    return %c0_i32, %arg0 : i32, i32
  }
  func.func @transform_1(%arg0: i32) -> (i32, i32) {
    %c0_i32 = arith.constant 0 : i32
    %c0_i32_0 = arith.constant 0 : i32
    return %c0_i32, %arg0 : i32, i32
  }
  func.func @transform_2(%arg0: i32) -> (i32, i32) {
    %c0_i32 = arith.constant 0 : i32
    %c0_i32_0 = arith.constant 0 : i32
    return %c0_i32, %arg0 : i32, i32
  }
}

</mosaic_0001>

<bundles_post_ra>
// kernel: tpu_custom_call.1
= control target key start
LH: loop header
LB: loop body
LE: loop exit
PB: predicated region body
PF: predicated region fallthrough
CT: control target
= control target key end

     0   :  { %7 = vsyncpa [#allocation3], 0  ;;  %s694_s0 = inlined_call_operand.hbm [shape: f32[1,1024], index: 0, kind: input, shape index: {}]   ;;  %s695_s1 = inlined_call_operand.hbm [shape: f32[1,1024], index: 1, kind: input, shape index: {}]   ;;  %s696_s2 = inlined_call_operand.hbm [shape: f32[1,1024], index: 2, kind: output, shape index: {}]  }
   0x1   :  { %9 = vsyncpa [#allocation3 + $0x1], 0 }
   0x2   :  { %10 = vsyncpa [#allocation6], 0 }
   0x3   :  { %12 = vsyncpa [#allocation6 + $0x1], 0 }
   0x4   :  { %13 = vsyncpa [#allocation4], 0 }
   0x5   :  { %15 = vsyncpa [#allocation4 + $0x1], 0  ;;  %s534_s9 = smov 0   ;;  %s536_s10 = smov 0  }
   0x6   :  { %s538_s11 = smov 0   ;;  %s540_s12 = smov 0  }
   0x7 LB: > { %s555_s13 = sadd.s32 4294967295, %s517_s12   ;;  %s321_s14 = sadd.s32 4294967294, %s517_s12   ;;  %s517_s12 = sphi %s540_s12, %s707_s12   ;;  %s513_s11 = sphi %s538_s11, %s706_s11   ;;  %s509_s10 = sphi %s536_s10, %s705_s10   ;;  %s505_s9 = sphi %s534_s9, %s704_s9  }
   0x8   : > { %s559_s15 = sadd.s32 1, %s517_s12   ;;  %s28_s16 = sadd.s32 1, %s513_s11 }
   0x9   : > { %s25_s17 = ssub.s32 %s517_s12, %s559_s15  ;;  %p35_p0 = scmp.ne.s32.totalorder %s513_s11, %s509_s10 }
   0xa   : > { %p26_p1 = scmp.eq.s32.totalorder %s25_s17, 0  ;;  %p36_p2 = scmp.eq.s32.totalorder %s517_s12, 0 }
   0xb   : > { %p41_p3 = scmp.ne.s32.totalorder %s509_s10, %s505_s9  ;;  %p42_p4 = scmp.eq.s32.totalorder %s555_s13, 0 }
   0xc   : > { %s571_s18 = scalar_select %p26_p1, %s513_s11, %s28_s16  }
   0xd   : > { %p573_p5 = por %p36_p2, %p35_p0  ;;  %p577_p6 = por %p42_p4, %p41_p3 }
   0xe   : > { %p91_p7 = scmp.eq.s32.totalorder %s555_s13, 1  ;;  %p97_p8 = scmp.eq.s32.totalorder %s321_s14, 1 }
   0xf   : > { %p353_p10 = scmp.lt.s32.totalorder %s517_s12, 2  ;;  %s593_s23 = sand.u32 1, %s513_s11  }
  0x10   : > { %p584_p11 = por %p91_p7, %p35_p0  ;;  %p588_p12 = por %p97_p8, %p41_p3 }
  0x11   : > { %s325_s24 = sshll.u32 %s517_s12, 2  ;;  %s324_s25 = sshll.u32 %s593_s23, 2 }
  0x12   : > { %s125_s28 = scalar_lea.hbm %s694_s0, %s325_s24  ;;  %s121_s30 = scalar_lea.vmem [#allocation2], %s324_s25 }
  0x13   : > { %s127_s29 = sshll.u32 %s125_s28, 4  ;;  %s129_s3 = sshll.u32 %s121_s30, 4  ;;  %s128_s29 = int_to_ptr.hbm [resolvable:$true] %s127_s29  ;;  %s130_s3 = int_to_ptr.vmem [resolvable:$true] %s129_s3 }
  0x14   : > { %p602_p13 = pnand %p353_p10, %p573_p5  ;;  %p328_p0 = scmp.ge.s32.totalorder %s517_s12, 1 }
  0x15   : > { %p153_p1 = scmp.lt.s32.totalorder %s517_s12, 3  ;;  %s118_s5 = scalar_lea.sflag [#allocation3], %s593_s23 }
  0x16   : > { %s387_s6 = sshra.s32 %s128_s29, 4  ;;  %p391_p3 = pneg %p602_p13  ;;  %s388_s6 = int_to_ptr.hbm [resolvable:$true] %s387_s6 }
  0x17   : > { %s389_s7 = scalar_lea.hbm %s388_s6, 4  ;;  %s394_s16 = scalar_lea.hbm %s694_s0, 8 }
  0x18   : > { %p390_p2 = scmp.ne.s32.totalorder %s388_s6, %s389_s7  ;;  %p395_p5 = scmp.lt.s32.totalorder %s388_s6, %s694_s0 }
  0x19   : > { %p396_p8 = scmp.lt.s32.totalorder %s394_s16, %s389_s7 }
  0x1a   : > { %p392_p4 = pnand %p391_p3, %p390_p2 }
  0x1b   : > { %p397_p10 = por %p396_p8, %p395_p5 }
  0x1c   : > { %p393_p7 = pneg %p392_p4 }
  0x1e   : > { %p398_p9 = pnand %p397_p10, %p393_p7 }
  0x20   : > { %401 = shalt.err (!%p398_p9)
}
  0x21   : > { %345 = dma.hbm_to_vmem [thread:$0]  (!%p602_p13), %s128_s29, 64, %s130_s3, %s118_s5  }
  0x22   : > { %p626_p2 = pnand %p328_p0, %p153_p1  ;;  %s144_s30 = scalar_lea.hbm %s695_s1, %s325_s24 }
  0x23   : > { %s146_s6 = sshll.u32 %s144_s30, 4  ;;  %s140_s7 = scalar_lea.vmem [#allocation5], %s324_s25  ;;  %s147_s6 = int_to_ptr.hbm [resolvable:$true] %s146_s6 }
  0x24   : > { %s148_s8 = sshll.u32 %s140_s7, 4  ;;  %s137_s14 = scalar_lea.sflag [#allocation6], %s593_s23  ;;  %s149_s8 = int_to_ptr.vmem [resolvable:$true] %s148_s8 }
  0x25   : > { %s417_s16 = sshra.s32 %s147_s6, 4  ;;  %s424_s5 = scalar_lea.hbm %s695_s1, 8  ;;  %s418_s16 = int_to_ptr.hbm [resolvable:$true] %s417_s16 }
  0x26   : > { %s419_s17 = scalar_lea.hbm %s418_s16, 4  ;;  %p425_p4 = scmp.lt.s32.totalorder %s418_s16, %s695_s1 }
  0x27   : > { %p420_p9 = scmp.ne.s32.totalorder %s418_s16, %s419_s17  ;;  %p426_p7 = scmp.lt.s32.totalorder %s424_s5, %s419_s17 }
  0x29   : > { %p422_p0 = pnand %p420_p9, %p391_p3  ;;  %p427_p5 = por %p426_p7, %p425_p4 }
  0x2b   : > { %p423_p1 = pneg %p422_p0 }
  0x2d   : > { %p428_p8 = pnand %p427_p5, %p423_p1 }
  0x2f   : > { %431 = shalt.err (!%p428_p8)
}
  0x30   : > { %348 = dma.hbm_to_vmem [thread:$0]  (!%p602_p13), %s147_s6, 64, %s149_s8, %s137_s14  }
  0x31   : > { %157 = sbr.rel (%p626_p2) target bundleno = 72 (0x48), region = 28  ;;  %s648_s23 = sand.u32 (!%p626_p2), 1, %s509_s10  }
  0x32   : > { %s329_s25 = sshll.u32 (!%p626_p2), %s648_s23, 2  ;;  %s160_s27 = scalar_lea.sflag (!%p626_p2), [#allocation3], %s648_s23 }
  0x33   : > { %s163_s28 = scalar_lea.vmem (!%p626_p2), [#allocation2], %s329_s25 }
  0x36   : > { %492 = dma.done.wait (%p577_p6), %s160_s27, 64  }
  0x37   : > { %494 = vsyncadd (%p577_p6), %s160_s27, 4294967232  ;;  %s170_s4 = scalar_lea.sflag [#allocation6], %s648_s23  ;;  %s173_s30 = scalar_lea.vmem [#allocation5], %s329_s25 }
  0x38   : > { %496 = dma.done.wait (%p577_p6), %s170_s4, 64  }
  0x39   : > { %498 = vsyncadd (%p577_p6), %s170_s4, 4294967232  ;;  %s333_s26 = sshll.u32 %s555_s13, 2  ;;  %v207_v0 = vlaneseq  ;;  %v203_v1 = vld [vmem:[%s163_s28] sm:$0xf]  ;;  %v204_v2 = vld [vmem:[%s173_s30] sm:$0xf] }
  0x3a   : > { %s223_s8 = scalar_lea.hbm %s696_s2, %s333_s26  ;;  %s199_s14 = scalar_lea.vmem [#allocation7], %s329_s25  ;;  %v205_v3 = vadd.f32 %v204_v2, %v203_v1 }
  0x3b   : > { %s225_s16 = sshll.u32 %s199_s14, 4  ;;  %s227_s17 = sshll.u32 %s223_s8, 4  ;;  %vm209_vm0 = vcmp.lt.s32.totalorder %v207_v0, 512  ;;  %s226_s16 = int_to_ptr.vmem [resolvable:$true] %s225_s16  ;;  %s228_s17 = int_to_ptr.hbm [resolvable:$true] %s227_s17 }
  0x3c   : > { %v206_v4 = vsub.f32 1.0, %v205_v3  ;;  %s213_s20 = scalar_lea.sflag [#allocation4], %s648_s23  ;;  %s461_s29 = sshra.s32 %s228_s17, 4  ;;  %s462_s29 = int_to_ptr.hbm [resolvable:$true] %s461_s29 }
  0x3d   : > { %s463_s13 = scalar_lea.hbm %s462_s29, 4  ;;  %s467_s19 = scalar_lea.hbm %s696_s2, 8 }
  0x3e   : > { %211 = vst.msk [vmem:[%s199_s14] sm:$0xf] %vm209_vm0, %v206_v4  ;;  %p464_p6 = scmp.ne.s32.totalorder %s462_s29, %s463_s13  ;;  %p468_p10 = scmp.lt.s32.totalorder %s462_s29, %s696_s2 }
  0x3f   : > { %p469_p2 = scmp.lt.s32.totalorder %s467_s19, %s463_s13 }
  0x40   : > { %p465_p13 = pnand %p464_p6, %p584_p11 }
  0x41   : > { %p470_p9 = por %p469_p2, %p468_p10 }
  0x42   : > { %p466_p3 = pneg %p465_p13 }
  0x44   : > { %p471_p0 = pnand %p470_p9, %p466_p3 }
  0x46   : > { %474 = shalt.err (!%p471_p0)
}
  0x47   : > { %340 = dma.vmem_to_hbm [thread:$0]  (%p584_p11), %s226_s16, 64, %s228_s17, %s213_s20  }
  0x48 PF: > { %s239_s23 = sand.u32 1, %s505_s9   ;;  %p703_p1 = scmp.ge.s32.totalorder %s517_s12, 2 }
  0x49   : > { %s240_s27 = scalar_lea.sflag [#allocation4], %s239_s23 }
  0x4a   : > { %p350_p4 = pnand %p703_p1, %p588_p12 }
  0x4c   : > { %p351_p7 = pneg %p350_p4 }
  0x4e   : > { %500 = dma.done.wait (%p351_p7), %s240_s27, 64  }
  0x4f   : > { %502 = vsyncadd (%p351_p7), %s240_s27, 4294967232  ;;  %p18_p5 = scmp.ge.s32.totalorder %s559_s15, 4   ;;  %s704_s9 = smov %s509_s10 }
  0x50   : > { %s705_s10 = smov %s513_s11  ;;  %s706_s11 = smov %s571_s18 }
  0x51   : > { %s707_s12 = smov %s559_s15  ;;  %20 = sbr.rel (!%p18_p5) target bundleno = 7 (0x7), region = 86 }
  0x56   :  { %246 = vsyncpa [#allocation3], 1 }
  0x57   :  { %248 = vsyncpa [#allocation3 + $0x1], 1 }
  0x58   :  { %249 = vsyncpa [#allocation6], 1 }
  0x59   :  { %251 = vsyncpa [#allocation6 + $0x1], 1 }
  0x5a   :  { %252 = vsyncpa [#allocation4], 1 }
  0x5b   :  { %254 = vsyncpa [#allocation4 + $0x1], 1 }

</bundles_post_ra>
